<compile_context>
chip_gen: v6e
topology: v6e:2x2x1
jax: 0.10.0
libtpu: 0.0.40
codegen_flags: <defaults>
</compile_context>

<pallas_src>
import functools

import jax
import jax.numpy as jnp
from jax.experimental import pallas as pl
from jax.experimental.pallas import tpu as pltpu


def _round_up(x, m):
    return ((x + m - 1) // m) * m


def _weight_from_d2(d2, power):
    """w = d2**(-power/2) == dist**(-power); `power` is a static float."""
    if power == 2.0:
        r = pl.reciprocal(d2, approx=True)
        return r * (2.0 - d2 * r)            # one Newton step: ~1e-8 rel err
    if power == 1.0:
        return jax.lax.rsqrt(d2)
    if power == 4.0:
        r = pl.reciprocal(d2, approx=True)
        r = r * (2.0 - d2 * r)
        return r * r
    if power == 3.0:
        r = pl.reciprocal(d2, approx=True)
        r = r * (2.0 - d2 * r)
        return jax.lax.rsqrt(d2) * r
    # Generic fallback: one exp/log pair on the EUP; still skips the sqrt.
    return d2 ** jnp.float32(-0.5 * power)


def _idw_kernel(power, n_stations, sx_ref, sy_ref, sv_ref, gx_ref, gy_ref,
                out_ref):
    # sx/sy/sv : (bt, S)              stations (batch on sublanes)
    # gx/gy    : (bt, Pt) or (1, Pt)  grid points, lane-dense
    # out      : (bt, Pt)             lane- and sublane-dense output
    bt, pt = out_ref.shape
    gx = gx_ref[...]
    gy = gy_ref[...]

    eps = jnp.float32(jnp.finfo(jnp.float32).eps)
    eps2 = eps * eps

    wsum = jnp.zeros((bt, pt), jnp.float32)
    numer = jnp.zeros((bt, pt), jnp.float32)

    # Static (unrolled) loop over stations: accumulation keeps live vregs to a
    # handful of (bt, Pt) temps independent of S and removes any XLU reduce.
    # TODO(synk): for very large S, switch to a lax.fori_loop over station
    # chunks (stations staged on sublanes) and/or offload the two reductions
    # to the idle MXU via a stacked [ones; values] (2, S) @ (S, Pt) matmul.
    for s in range(n_stations):
        sx = sx_ref[:, s:s + 1]              # (bt, 1) -> lane broadcast
        sy = sy_ref[:, s:s + 1]
        sv = sv_ref[:, s:s + 1]
        dx = gx - sx
        dy = gy - sy
        d2 = dx * dx + dy * dy
        # Clamp only exactly-zero distances (matches the reference exactly;
        # jnp.maximum would change results for near-coincident points).
        d2 = jnp.where(d2 == 0.0, eps2, d2)
        w = _weight_from_d2(d2, power)
        wsum = wsum + w
        numer = numer + w * sv

    # Final divide kept exact (only 1/S of the elementwise work).
    out_ref[...] = numer / wsum


def idw_interpolate(station_coords, station_values, grid_points, power=2.0,
                    pt_max=512, grid_shared_across_batch=False):
    """Pallas equivalent of TorchIDWInterpolator(power).forward(...).

    Args:
      station_coords : (B, S, 2) float32
      station_values : (B, S)    float32
      grid_points    : (B, P, 2) float32
      power          : static IDW power parameter
      pt_max         : max grid-point (lane) tile size per grid step
      grid_shared_across_batch : if True, grid_points[0] is reused for every
        batch element (no per-batch DMA of identical grid data).
    Returns:
      (B, P) float32 interpolated values.
    """
    B, S, _ = station_coords.shape
    _, P, _ = grid_points.shape
    f32 = jnp.float32

    sx = station_coords[..., 0].astype(f32)          # (B, S)
    sy = station_coords[..., 1].astype(f32)
    sv = station_values.astype(f32)                  # (B, S)
    gx = grid_points[..., 0].astype(f32)             # (B, P)
    gy = grid_points[..., 1].astype(f32)

    # Batch blocking: block second-to-last dims must be the full size or a
    # multiple of 8 (sublane tiling).
    if B <= 8:
        bt, b_pad = B, B
    else:
        bt, b_pad = 8, _round_up(B, 8)

    # Lane-dense P tile: multiple of 128, capped at pt_max.  Keeps ~7 live
    # (bt, Pt) f32 temps well under the 64-vreg file and per-step VMEM tiny.
    pt = min(_round_up(P, 128), _round_up(pt_max, 128))
    p_pad = _round_up(P, pt)

    if b_pad != B:
        bpad = ((0, b_pad - B), (0, 0))
        sx, sy, sv = (jnp.pad(a, bpad) for a in (sx, sy, sv))
    if grid_shared_across_batch:
        gx, gy = gx[:1], gy[:1]
    elif b_pad != B:
        bpad = ((0, b_pad - B), (0, 0))
        gx, gy = (jnp.pad(a, bpad) for a in (gx, gy))
    if p_pad != P:
        ppad = ((0, 0), (0, p_pad - P))
        gx, gy = (jnp.pad(a, ppad) for a in (gx, gy))

    station_spec = pl.BlockSpec((bt, S), lambda b, p: (b, 0))
    if grid_shared_across_batch:
        gridpt_spec = pl.BlockSpec((1, pt), lambda b, p: (0, p))
    else:
        gridpt_spec = pl.BlockSpec((bt, pt), lambda b, p: (b, p))
    out_spec = pl.BlockSpec((bt, pt), lambda b, p: (b, p))

    kernel = functools.partial(_idw_kernel, float(power), S)

    out = pl.pallas_call(
        kernel,
        out_shape=jax.ShapeDtypeStruct((b_pad, p_pad), f32),
        grid_spec=pltpu.PrefetchScalarGridSpec(
            num_scalar_prefetch=0,
            grid=(b_pad // bt, p_pad // pt),      # P axis innermost
            in_specs=[station_spec, station_spec, station_spec,
                      gridpt_spec, gridpt_spec],
            out_specs=out_spec,
        ),
        compiler_params=pltpu.CompilerParams(
            dimension_semantics=("parallel", "parallel")),
    )(sx, sy, sv, gx, gy)

    return out[:B, :P]


def _idw_reference(station_coords, station_values, grid_points, power=2.0):
    """Pure-JAX reference mirroring the PyTorch forward exactly."""
    grid_expanded = grid_points[:, :, None, :]          # (B, P, 1, 2)
    stations_expanded = station_coords[:, None, :, :]   # (B, 1, S, 2)
    distances = jnp.sqrt(
        jnp.sum((grid_expanded - stations_expanded) ** 2, axis=-1))
    eps = jnp.finfo(jnp.float32).eps
    distances = jnp.where(distances == 0, eps, distances)
    weights = 1.0 / distances ** power
    weights_sum = jnp.sum(weights, axis=-1, keepdims=True)
    vals = station_values[:, None, :]
    return jnp.sum(weights * vals, axis=-1) / weights_sum[..., 0]


if __name__ == "__main__":
    key = jax.random.PRNGKey(0)
    k1, k2 = jax.random.split(key, 2)

    B = 2          # batch
    S = 8          # stations
    GRID = 16      # 16x16 regular grid -> P = 256 grid points
    P = GRID * GRID

    # Deterministic synthetic inputs (lon/lat in [0, 10), values in [0, 1)).
    station_coords = jax.random.uniform(k1, (B, S, 2), jnp.float32) * 10.0
    station_values = jax.random.uniform(k2, (B, S), jnp.float32)

    lon = jnp.arange(0.0, 10.0, 10.0 / GRID, dtype=jnp.float32)
    lat = jnp.arange(0.0, 10.0, 10.0 / GRID, dtype=jnp.float32)
    glon, glat = jnp.meshgrid(lon, lat, indexing="ij")
    grid_points = jnp.stack([glon.reshape(-1), glat.reshape(-1)], axis=-1)
    grid_points = jnp.broadcast_to(grid_points[None], (B, P, 2))

    # power == 2 fast path (approx rcp + Newton).
    out = idw_interpolate(station_coords, station_values, grid_points,
                          power=2.0)
    out = jax.block_until_ready(out)
    ref = _idw_reference(station_coords, station_values, grid_points,
                         power=2.0)
    assert out.shape == (B, P), out.shape
    assert jnp.allclose(out, ref, rtol=1e-5, atol=1e-5), \
        float(jnp.max(jnp.abs(out - ref)))

    # Shared-grid fast path (grid is identical across batch in this demo).
    out_shared = idw_interpolate(station_coords, station_values, grid_points,
                                 power=2.0, grid_shared_across_batch=True)
    out_shared = jax.block_until_ready(out_shared)
    assert jnp.allclose(out_shared, ref, rtol=1e-5, atol=1e-5), \
        float(jnp.max(jnp.abs(out_shared - ref)))

    # Specialized non-2 power (rsqrt * rcp path).
    out3 = idw_interpolate(station_coords, station_values, grid_points,
                           power=3.0)
    out3 = jax.block_until_ready(out3)
    ref3 = _idw_reference(station_coords, station_values, grid_points,
                          power=3.0)
    assert jnp.allclose(out3, ref3, rtol=1e-5, atol=1e-5), \
        float(jnp.max(jnp.abs(out3 - ref3)))

    print("KERNEL_OK")
</pallas_src>

<mosaic_0001>
module attributes {stable_mosaic.version = 11 : i64} {
  func.func @_idw_kernel(%arg0: i32, %arg1: i32, %arg2: memref<2x8xf32, #tpu.memory_space<vmem>>, %arg3: memref<2x8xf32, #tpu.memory_space<vmem>>, %arg4: memref<2x8xf32, #tpu.memory_space<vmem>>, %arg5: memref<2x256xf32, #tpu.memory_space<vmem>>, %arg6: memref<2x256xf32, #tpu.memory_space<vmem>>, %arg7: memref<2x256xf32, #tpu.memory_space<vmem>>) attributes {dimension_semantics = [#tpu.dimension_semantics<parallel>, #tpu.dimension_semantics<parallel>], iteration_bounds = array<i64: 1, 1>, scalar_prefetch = 0 : i64, scratch_operands = 0 : i64, tpu.core_type = #tpu.core_type<tc>, window_params = [{transform_indices = @transform_0, window_bounds = array<i64: 2, 8>}, {transform_indices = @transform_1, window_bounds = array<i64: 2, 8>}, {transform_indices = @transform_2, window_bounds = array<i64: 2, 8>}, {transform_indices = @transform_3, window_bounds = array<i64: 2, 256>}, {transform_indices = @transform_4, window_bounds = array<i64: 2, 256>}, {transform_indices = @transform_5, window_bounds = array<i64: 2, 256>}]} {
    %c0 = arith.constant 0 : index
    %c0_0 = arith.constant 0 : index
    %0 = vector.load %arg5[%c0, %c0_0] : memref<2x256xf32, #tpu.memory_space<vmem>>, vector<2x256xf32>
    %c0_1 = arith.constant 0 : index
    %c0_2 = arith.constant 0 : index
    %1 = vector.load %arg6[%c0_1, %c0_2] : memref<2x256xf32, #tpu.memory_space<vmem>>, vector<2x256xf32>
    %cst = arith.constant 1.1920929E-7 : f32
    %cst_3 = arith.constant 1.1920929E-7 : f32
    %2 = arith.mulf %cst, %cst_3 : f32
    %cst_4 = arith.constant 0.000000e+00 : f32
    %3 = vector.broadcast %cst_4 : f32 to vector<2x256xf32>
    %cst_5 = arith.constant 0.000000e+00 : f32
    %4 = vector.broadcast %cst_5 : f32 to vector<2x256xf32>
    %c0_6 = arith.constant 0 : index
    %c0_7 = arith.constant 0 : index
    %5 = vector.load %arg2[%c0_6, %c0_7] : memref<2x8xf32, #tpu.memory_space<vmem>>, vector<2x1xf32>
    %c0_8 = arith.constant 0 : index
    %c0_9 = arith.constant 0 : index
    %6 = vector.load %arg3[%c0_8, %c0_9] : memref<2x8xf32, #tpu.memory_space<vmem>>, vector<2x1xf32>
    %c0_10 = arith.constant 0 : index
    %c0_11 = arith.constant 0 : index
    %7 = vector.load %arg4[%c0_10, %c0_11] : memref<2x8xf32, #tpu.memory_space<vmem>>, vector<2x1xf32>
    %8 = vector.broadcast %5 : vector<2x1xf32> to vector<2x256xf32>
    %9 = arith.subf %0, %8 : vector<2x256xf32>
    %10 = vector.broadcast %6 : vector<2x1xf32> to vector<2x256xf32>
    %11 = arith.subf %1, %10 : vector<2x256xf32>
    %12 = arith.mulf %9, %9 : vector<2x256xf32>
    %13 = arith.mulf %11, %11 : vector<2x256xf32>
    %14 = arith.addf %12, %13 : vector<2x256xf32>
    %cst_12 = arith.constant 0.000000e+00 : f32
    %15 = vector.broadcast %cst_12 : f32 to vector<2x256xf32>
    %16 = arith.cmpf oeq, %14, %15 : vector<2x256xf32>
    %17 = vector.broadcast %2 : f32 to vector<2x256xf32>
    %18 = arith.select %16, %17, %14 : vector<2x256xi1>, vector<2x256xf32>
    %19 = tpu.reciprocal %18 {approx = true} : vector<2x256xf32> -> vector<2x256xf32>
    %20 = arith.mulf %18, %19 : vector<2x256xf32>
    %cst_13 = arith.constant 2.000000e+00 : f32
    %21 = vector.broadcast %cst_13 : f32 to vector<2x256xf32>
    %22 = arith.subf %21, %20 : vector<2x256xf32>
    %23 = arith.mulf %19, %22 : vector<2x256xf32>
    %24 = arith.addf %3, %23 : vector<2x256xf32>
    %25 = vector.broadcast %7 : vector<2x1xf32> to vector<2x256xf32>
    %26 = arith.mulf %23, %25 : vector<2x256xf32>
    %27 = arith.addf %4, %26 : vector<2x256xf32>
    %c0_14 = arith.constant 0 : index
    %c1 = arith.constant 1 : index
    %28 = vector.load %arg2[%c0_14, %c1] : memref<2x8xf32, #tpu.memory_space<vmem>>, vector<2x1xf32>
    %c0_15 = arith.constant 0 : index
    %c1_16 = arith.constant 1 : index
    %29 = vector.load %arg3[%c0_15, %c1_16] : memref<2x8xf32, #tpu.memory_space<vmem>>, vector<2x1xf32>
    %c0_17 = arith.constant 0 : index
    %c1_18 = arith.constant 1 : index
    %30 = vector.load %arg4[%c0_17, %c1_18] : memref<2x8xf32, #tpu.memory_space<vmem>>, vector<2x1xf32>
    %31 = vector.broadcast %28 : vector<2x1xf32> to vector<2x256xf32>
    %32 = arith.subf %0, %31 : vector<2x256xf32>
    %33 = vector.broadcast %29 : vector<2x1xf32> to vector<2x256xf32>
    %34 = arith.subf %1, %33 : vector<2x256xf32>
    %35 = arith.mulf %32, %32 : vector<2x256xf32>
    %36 = arith.mulf %34, %34 : vector<2x256xf32>
    %37 = arith.addf %35, %36 : vector<2x256xf32>
    %cst_19 = arith.constant 0.000000e+00 : f32
    %38 = vector.broadcast %cst_19 : f32 to vector<2x256xf32>
    %39 = arith.cmpf oeq, %37, %38 : vector<2x256xf32>
    %40 = vector.broadcast %2 : f32 to vector<2x256xf32>
    %41 = arith.select %39, %40, %37 : vector<2x256xi1>, vector<2x256xf32>
    %42 = tpu.reciprocal %41 {approx = true} : vector<2x256xf32> -> vector<2x256xf32>
    %43 = arith.mulf %41, %42 : vector<2x256xf32>
    %cst_20 = arith.constant 2.000000e+00 : f32
    %44 = vector.broadcast %cst_20 : f32 to vector<2x256xf32>
    %45 = arith.subf %44, %43 : vector<2x256xf32>
    %46 = arith.mulf %42, %45 : vector<2x256xf32>
    %47 = arith.addf %24, %46 : vector<2x256xf32>
    %48 = vector.broadcast %30 : vector<2x1xf32> to vector<2x256xf32>
    %49 = arith.mulf %46, %48 : vector<2x256xf32>
    %50 = arith.addf %27, %49 : vector<2x256xf32>
    %c0_21 = arith.constant 0 : index
    %c2 = arith.constant 2 : index
    %51 = vector.load %arg2[%c0_21, %c2] : memref<2x8xf32, #tpu.memory_space<vmem>>, vector<2x1xf32>
    %c0_22 = arith.constant 0 : index
    %c2_23 = arith.constant 2 : index
    %52 = vector.load %arg3[%c0_22, %c2_23] : memref<2x8xf32, #tpu.memory_space<vmem>>, vector<2x1xf32>
    %c0_24 = arith.constant 0 : index
    %c2_25 = arith.constant 2 : index
    %53 = vector.load %arg4[%c0_24, %c2_25] : memref<2x8xf32, #tpu.memory_space<vmem>>, vector<2x1xf32>
    %54 = vector.broadcast %51 : vector<2x1xf32> to vector<2x256xf32>
    %55 = arith.subf %0, %54 : vector<2x256xf32>
    %56 = vector.broadcast %52 : vector<2x1xf32> to vector<2x256xf32>
    %57 = arith.subf %1, %56 : vector<2x256xf32>
    %58 = arith.mulf %55, %55 : vector<2x256xf32>
    %59 = arith.mulf %57, %57 : vector<2x256xf32>
    %60 = arith.addf %58, %59 : vector<2x256xf32>
    %cst_26 = arith.constant 0.000000e+00 : f32
    %61 = vector.broadcast %cst_26 : f32 to vector<2x256xf32>
    %62 = arith.cmpf oeq, %60, %61 : vector<2x256xf32>
    %63 = vector.broadcast %2 : f32 to vector<2x256xf32>
    %64 = arith.select %62, %63, %60 : vector<2x256xi1>, vector<2x256xf32>
    %65 = tpu.reciprocal %64 {approx = true} : vector<2x256xf32> -> vector<2x256xf32>
    %66 = arith.mulf %64, %65 : vector<2x256xf32>
    %cst_27 = arith.constant 2.000000e+00 : f32
    %67 = vector.broadcast %cst_27 : f32 to vector<2x256xf32>
    %68 = arith.subf %67, %66 : vector<2x256xf32>
    %69 = arith.mulf %65, %68 : vector<2x256xf32>
    %70 = arith.addf %47, %69 : vector<2x256xf32>
    %71 = vector.broadcast %53 : vector<2x1xf32> to vector<2x256xf32>
    %72 = arith.mulf %69, %71 : vector<2x256xf32>
    %73 = arith.addf %50, %72 : vector<2x256xf32>
    %c0_28 = arith.constant 0 : index
    %c3 = arith.constant 3 : index
    %74 = vector.load %arg2[%c0_28, %c3] : memref<2x8xf32, #tpu.memory_space<vmem>>, vector<2x1xf32>
    %c0_29 = arith.constant 0 : index
    %c3_30 = arith.constant 3 : index
    %75 = vector.load %arg3[%c0_29, %c3_30] : memref<2x8xf32, #tpu.memory_space<vmem>>, vector<2x1xf32>
    %c0_31 = arith.constant 0 : index
    %c3_32 = arith.constant 3 : index
    %76 = vector.load %arg4[%c0_31, %c3_32] : memref<2x8xf32, #tpu.memory_space<vmem>>, vector<2x1xf32>
    %77 = vector.broadcast %74 : vector<2x1xf32> to vector<2x256xf32>
    %78 = arith.subf %0, %77 : vector<2x256xf32>
    %79 = vector.broadcast %75 : vector<2x1xf32> to vector<2x256xf32>
    %80 = arith.subf %1, %79 : vector<2x256xf32>
    %81 = arith.mulf %78, %78 : vector<2x256xf32>
    %82 = arith.mulf %80, %80 : vector<2x256xf32>
    %83 = arith.addf %81, %82 : vector<2x256xf32>
    %cst_33 = arith.constant 0.000000e+00 : f32
    %84 = vector.broadcast %cst_33 : f32 to vector<2x256xf32>
    %85 = arith.cmpf oeq, %83, %84 : vector<2x256xf32>
    %86 = vector.broadcast %2 : f32 to vector<2x256xf32>
    %87 = arith.select %85, %86, %83 : vector<2x256xi1>, vector<2x256xf32>
    %88 = tpu.reciprocal %87 {approx = true} : vector<2x256xf32> -> vector<2x256xf32>
    %89 = arith.mulf %87, %88 : vector<2x256xf32>
    %cst_34 = arith.constant 2.000000e+00 : f32
    %90 = vector.broadcast %cst_34 : f32 to vector<2x256xf32>
    %91 = arith.subf %90, %89 : vector<2x256xf32>
    %92 = arith.mulf %88, %91 : vector<2x256xf32>
    %93 = arith.addf %70, %92 : vector<2x256xf32>
    %94 = vector.broadcast %76 : vector<2x1xf32> to vector<2x256xf32>
    %95 = arith.mulf %92, %94 : vector<2x256xf32>
    %96 = arith.addf %73, %95 : vector<2x256xf32>
    %c0_35 = arith.constant 0 : index
    %c4 = arith.constant 4 : index
    %97 = vector.load %arg2[%c0_35, %c4] : memref<2x8xf32, #tpu.memory_space<vmem>>, vector<2x1xf32>
    %c0_36 = arith.constant 0 : index
    %c4_37 = arith.constant 4 : index
    %98 = vector.load %arg3[%c0_36, %c4_37] : memref<2x8xf32, #tpu.memory_space<vmem>>, vector<2x1xf32>
    %c0_38 = arith.constant 0 : index
    %c4_39 = arith.constant 4 : index
    %99 = vector.load %arg4[%c0_38, %c4_39] : memref<2x8xf32, #tpu.memory_space<vmem>>, vector<2x1xf32>
    %100 = vector.broadcast %97 : vector<2x1xf32> to vector<2x256xf32>
    %101 = arith.subf %0, %100 : vector<2x256xf32>
    %102 = vector.broadcast %98 : vector<2x1xf32> to vector<2x256xf32>
    %103 = arith.subf %1, %102 : vector<2x256xf32>
    %104 = arith.mulf %101, %101 : vector<2x256xf32>
    %105 = arith.mulf %103, %103 : vector<2x256xf32>
    %106 = arith.addf %104, %105 : vector<2x256xf32>
    %cst_40 = arith.constant 0.000000e+00 : f32
    %107 = vector.broadcast %cst_40 : f32 to vector<2x256xf32>
    %108 = arith.cmpf oeq, %106, %107 : vector<2x256xf32>
    %109 = vector.broadcast %2 : f32 to vector<2x256xf32>
    %110 = arith.select %108, %109, %106 : vector<2x256xi1>, vector<2x256xf32>
    %111 = tpu.reciprocal %110 {approx = true} : vector<2x256xf32> -> vector<2x256xf32>
    %112 = arith.mulf %110, %111 : vector<2x256xf32>
    %cst_41 = arith.constant 2.000000e+00 : f32
    %113 = vector.broadcast %cst_41 : f32 to vector<2x256xf32>
    %114 = arith.subf %113, %112 : vector<2x256xf32>
    %115 = arith.mulf %111, %114 : vector<2x256xf32>
    %116 = arith.addf %93, %115 : vector<2x256xf32>
    %117 = vector.broadcast %99 : vector<2x1xf32> to vector<2x256xf32>
    %118 = arith.mulf %115, %117 : vector<2x256xf32>
    %119 = arith.addf %96, %118 : vector<2x256xf32>
    %c0_42 = arith.constant 0 : index
    %c5 = arith.constant 5 : index
    %120 = vector.load %arg2[%c0_42, %c5] : memref<2x8xf32, #tpu.memory_space<vmem>>, vector<2x1xf32>
    %c0_43 = arith.constant 0 : index
    %c5_44 = arith.constant 5 : index
    %121 = vector.load %arg3[%c0_43, %c5_44] : memref<2x8xf32, #tpu.memory_space<vmem>>, vector<2x1xf32>
    %c0_45 = arith.constant 0 : index
    %c5_46 = arith.constant 5 : index
    %122 = vector.load %arg4[%c0_45, %c5_46] : memref<2x8xf32, #tpu.memory_space<vmem>>, vector<2x1xf32>
    %123 = vector.broadcast %120 : vector<2x1xf32> to vector<2x256xf32>
    %124 = arith.subf %0, %123 : vector<2x256xf32>
    %125 = vector.broadcast %121 : vector<2x1xf32> to vector<2x256xf32>
    %126 = arith.subf %1, %125 : vector<2x256xf32>
    %127 = arith.mulf %124, %124 : vector<2x256xf32>
    %128 = arith.mulf %126, %126 : vector<2x256xf32>
    %129 = arith.addf %127, %128 : vector<2x256xf32>
    %cst_47 = arith.constant 0.000000e+00 : f32
    %130 = vector.broadcast %cst_47 : f32 to vector<2x256xf32>
    %131 = arith.cmpf oeq, %129, %130 : vector<2x256xf32>
    %132 = vector.broadcast %2 : f32 to vector<2x256xf32>
    %133 = arith.select %131, %132, %129 : vector<2x256xi1>, vector<2x256xf32>
    %134 = tpu.reciprocal %133 {approx = true} : vector<2x256xf32> -> vector<2x256xf32>
    %135 = arith.mulf %133, %134 : vector<2x256xf32>
    %cst_48 = arith.constant 2.000000e+00 : f32
    %136 = vector.broadcast %cst_48 : f32 to vector<2x256xf32>
    %137 = arith.subf %136, %135 : vector<2x256xf32>
    %138 = arith.mulf %134, %137 : vector<2x256xf32>
    %139 = arith.addf %116, %138 : vector<2x256xf32>
    %140 = vector.broadcast %122 : vector<2x1xf32> to vector<2x256xf32>
    %141 = arith.mulf %138, %140 : vector<2x256xf32>
    %142 = arith.addf %119, %141 : vector<2x256xf32>
    %c0_49 = arith.constant 0 : index
    %c6 = arith.constant 6 : index
    %143 = vector.load %arg2[%c0_49, %c6] : memref<2x8xf32, #tpu.memory_space<vmem>>, vector<2x1xf32>
    %c0_50 = arith.constant 0 : index
    %c6_51 = arith.constant 6 : index
    %144 = vector.load %arg3[%c0_50, %c6_51] : memref<2x8xf32, #tpu.memory_space<vmem>>, vector<2x1xf32>
    %c0_52 = arith.constant 0 : index
    %c6_53 = arith.constant 6 : index
    %145 = vector.load %arg4[%c0_52, %c6_53] : memref<2x8xf32, #tpu.memory_space<vmem>>, vector<2x1xf32>
    %146 = vector.broadcast %143 : vector<2x1xf32> to vector<2x256xf32>
    %147 = arith.subf %0, %146 : vector<2x256xf32>
    %148 = vector.broadcast %144 : vector<2x1xf32> to vector<2x256xf32>
    %149 = arith.subf %1, %148 : vector<2x256xf32>
    %150 = arith.mulf %147, %147 : vector<2x256xf32>
    %151 = arith.mulf %149, %149 : vector<2x256xf32>
    %152 = arith.addf %150, %151 : vector<2x256xf32>
    %cst_54 = arith.constant 0.000000e+00 : f32
    %153 = vector.broadcast %cst_54 : f32 to vector<2x256xf32>
    %154 = arith.cmpf oeq, %152, %153 : vector<2x256xf32>
    %155 = vector.broadcast %2 : f32 to vector<2x256xf32>
    %156 = arith.select %154, %155, %152 : vector<2x256xi1>, vector<2x256xf32>
    %157 = tpu.reciprocal %156 {approx = true} : vector<2x256xf32> -> vector<2x256xf32>
    %158 = arith.mulf %156, %157 : vector<2x256xf32>
    %cst_55 = arith.constant 2.000000e+00 : f32
    %159 = vector.broadcast %cst_55 : f32 to vector<2x256xf32>
    %160 = arith.subf %159, %158 : vector<2x256xf32>
    %161 = arith.mulf %157, %160 : vector<2x256xf32>
    %162 = arith.addf %139, %161 : vector<2x256xf32>
    %163 = vector.broadcast %145 : vector<2x1xf32> to vector<2x256xf32>
    %164 = arith.mulf %161, %163 : vector<2x256xf32>
    %165 = arith.addf %142, %164 : vector<2x256xf32>
    %c0_56 = arith.constant 0 : index
    %c7 = arith.constant 7 : index
    %166 = vector.load %arg2[%c0_56, %c7] : memref<2x8xf32, #tpu.memory_space<vmem>>, vector<2x1xf32>
    %c0_57 = arith.constant 0 : index
    %c7_58 = arith.constant 7 : index
    %167 = vector.load %arg3[%c0_57, %c7_58] : memref<2x8xf32, #tpu.memory_space<vmem>>, vector<2x1xf32>
    %c0_59 = arith.constant 0 : index
    %c7_60 = arith.constant 7 : index
    %168 = vector.load %arg4[%c0_59, %c7_60] : memref<2x8xf32, #tpu.memory_space<vmem>>, vector<2x1xf32>
    %169 = vector.broadcast %166 : vector<2x1xf32> to vector<2x256xf32>
    %170 = arith.subf %0, %169 : vector<2x256xf32>
    %171 = vector.broadcast %167 : vector<2x1xf32> to vector<2x256xf32>
    %172 = arith.subf %1, %171 : vector<2x256xf32>
    %173 = arith.mulf %170, %170 : vector<2x256xf32>
    %174 = arith.mulf %172, %172 : vector<2x256xf32>
    %175 = arith.addf %173, %174 : vector<2x256xf32>
    %cst_61 = arith.constant 0.000000e+00 : f32
    %176 = vector.broadcast %cst_61 : f32 to vector<2x256xf32>
    %177 = arith.cmpf oeq, %175, %176 : vector<2x256xf32>
    %178 = vector.broadcast %2 : f32 to vector<2x256xf32>
    %179 = arith.select %177, %178, %175 : vector<2x256xi1>, vector<2x256xf32>
    %180 = tpu.reciprocal %179 {approx = true} : vector<2x256xf32> -> vector<2x256xf32>
    %181 = arith.mulf %179, %180 : vector<2x256xf32>
    %cst_62 = arith.constant 2.000000e+00 : f32
    %182 = vector.broadcast %cst_62 : f32 to vector<2x256xf32>
    %183 = arith.subf %182, %181 : vector<2x256xf32>
    %184 = arith.mulf %180, %183 : vector<2x256xf32>
    %185 = arith.addf %162, %184 : vector<2x256xf32>
    %186 = vector.broadcast %168 : vector<2x1xf32> to vector<2x256xf32>
    %187 = arith.mulf %184, %186 : vector<2x256xf32>
    %188 = arith.addf %165, %187 : vector<2x256xf32>
    %189 = arith.divf %188, %185 : vector<2x256xf32>
    %c0_63 = arith.constant 0 : index
    %c0_64 = arith.constant 0 : index
    %190 = vector.load %arg7[%c0_63, %c0_64] : memref<2x256xf32, #tpu.memory_space<vmem>>, vector<2x256xf32>
    tpu.vector_store %arg7[%c0_63, %c0_64], %189 {strides = array<i32>} : memref<2x256xf32, #tpu.memory_space<vmem>>, vector<2x256xf32>,
    return
  }
  func.func @transform_0(%arg0: i32, %arg1: i32) -> (i32, i32) {
    %c0_i32 = arith.constant 0 : i32
    %c0_i32_0 = arith.constant 0 : i32
    return %arg0, %c0_i32 : i32, i32
  }
  func.func @transform_1(%arg0: i32, %arg1: i32) -> (i32, i32) {
    %c0_i32 = arith.constant 0 : i32
    %c0_i32_0 = arith.constant 0 : i32
    return %arg0, %c0_i32 : i32, i32
  }
  func.func @transform_2(%arg0: i32, %arg1: i32) -> (i32, i32) {
    %c0_i32 = arith.constant 0 : i32
    %c0_i32_0 = arith.constant 0 : i32
    return %arg0, %c0_i32 : i32, i32
  }
  func.func @transform_3(%arg0: i32, %arg1: i32) -> (i32, i32) {
    %c0_i32 = arith.constant 0 : i32
    return %arg0, %arg1 : i32, i32
  }
  func.func @transform_4(%arg0: i32, %arg1: i32) -> (i32, i32) {
    %c0_i32 = arith.constant 0 : i32
    return %arg0, %arg1 : i32, i32
  }
  func.func @transform_5(%arg0: i32, %arg1: i32) -> (i32, i32) {
    %c0_i32 = arith.constant 0 : i32
    return %arg0, %arg1 : i32, i32
  }
}

</mosaic_0001>

<bundles_post_ra>
// kernel: tpu_custom_call.1
= control target key start
LH: loop header
LB: loop body
LE: loop exit
PB: predicated region body
PF: predicated region fallthrough
CT: control target
= control target key end

     0   :  { %10 = vsyncpa [#allocation3], 0  ;;  %s741_s0 = inlined_call_operand.hbm [shape: f32[2,8], index: 0, kind: input, shape index: {}]   ;;  %s742_s1 = inlined_call_operand.hbm [shape: f32[2,8], index: 1, kind: input, shape index: {}]   ;;  %s743_s2 = inlined_call_operand.hbm [shape: f32[2,8], index: 2, kind: input, shape index: {}]   ;;  %s744_s3 = inlined_call_operand.vmem [shape: f32[2,256], index: 3, kind: input, shape index: {}]   ;;  %s745_s4 = inlined_call_operand.hbm [shape: f32[2,256], index: 4, kind: input, shape index: {}]   ;;  %s746_s5 = inlined_call_operand.hbm [shape: f32[2,256], index: 5, kind: output, shape index: {}]  }
   0x1   :  { %11 = vsyncpa [#allocation6], 0 }
   0x2   :  { %12 = vsyncpa [#allocation9], 0 }
   0x3   :  { %13 = vsyncpa [#allocation4], 0  ;;  %s633_s18 = smov [#allocation5]   ;;  %s634_s20 = smov [#allocation2]  }
   0x4   :  { %s30_s19 = sshll.u32 %s633_s18, 4  ;;  %s20_s21 = sshll.u32 %s634_s20, 4  ;;  %s31_s19 = int_to_ptr.vmem [resolvable:$true] %s30_s19  ;;  %s21_s21 = int_to_ptr.vmem [resolvable:$true] %s20_s21 }
   0x5   :  { %s533_s22 = scalar_lea.vmem %s31_s19, 32  ;;  %p538_p1 = scmp.lt.s32.totalorder %s31_s19, %s31_s19 }
   0x6   :  { %p534_p0 = scmp.ne.s32.totalorder %s31_s19, %s533_s22  ;;  %p539_p2 = scmp.lt.s32.totalorder %s533_s22, %s533_s22 }
   0x8   :  { %p540_p3 = por %p539_p2, %p538_p1 }
   0xa   :  { %p541_p4 = pnand %p540_p3, %p534_p0 }
   0xc   :  { %544 = shalt.err (!%p541_p4)
}
   0xd   :  { %33 = dma.hbm_to_vmem [thread:$0]  %s742_s1, 32, %s31_s19, [#allocation6]  }
   0xe   :  { %s553_s25 = scalar_lea.vmem %s21_s21, 32  ;;  %p558_p6 = scmp.lt.s32.totalorder %s21_s21, %s21_s21 }
   0xf   :  { %p554_p5 = scmp.ne.s32.totalorder %s21_s21, %s553_s25  ;;  %p559_p7 = scmp.lt.s32.totalorder %s553_s25, %s553_s25 }
  0x11   :  { %p560_p8 = por %p559_p7, %p558_p6 }
  0x13   :  { %p561_p9 = pnand %p560_p8, %p554_p5 }
  0x15   :  { %564 = shalt.err (!%p561_p9)
}
  0x16   :  { %23 = dma.hbm_to_vmem [thread:$0]  %s741_s0, 32, %s21_s21, [#allocation3]  }
  0x17   :  { %s635_s28 = smov [#allocation7]   ;;  %s636_s30 = smov [#allocation8]  }
  0x18   :  { %s40_s29 = sshll.u32 %s635_s28, 4  ;;  %s52_s6 = sshll.u32 %s636_s30, 4  ;;  %s41_s29 = int_to_ptr.vmem [resolvable:$true] %s40_s29  ;;  %s53_s6 = int_to_ptr.vmem [resolvable:$true] %s52_s6 }
  0x19   :  { %s573_s7 = scalar_lea.vmem %s41_s29, 32  ;;  %p578_p11 = scmp.lt.s32.totalorder %s41_s29, %s41_s29 }
  0x1a   :  { %p574_p10 = scmp.ne.s32.totalorder %s41_s29, %s573_s7  ;;  %p579_p12 = scmp.lt.s32.totalorder %s573_s7, %s573_s7 }
  0x1c   :  { %p580_p13 = por %p579_p12, %p578_p11 }
  0x1e   :  { %p581_p0 = pnand %p580_p13, %p574_p10 }
  0x20   :  { %584 = shalt.err (!%p581_p0)
}
  0x21   :  { %43 = dma.hbm_to_vmem [thread:$0]  %s743_s2, 32, %s41_s29, [#allocation6]  }
  0x22   :  { %s593_s9 = scalar_lea.vmem %s53_s6, 64  ;;  %p598_p2 = scmp.lt.s32.totalorder %s53_s6, %s53_s6 }
  0x23   :  { %p594_p1 = scmp.ne.s32.totalorder %s53_s6, %s593_s9  ;;  %p599_p3 = scmp.lt.s32.totalorder %s593_s9, %s593_s9 }
  0x25   :  { %p600_p4 = por %p599_p3, %p598_p2 }
  0x27   :  { %p601_p5 = pnand %p600_p4, %p594_p1 }
  0x29   :  { %604 = shalt.err (!%p601_p5)
}
  0x2a   :  { %55 = dma.hbm_to_vmem [thread:$0]  %s745_s4, 64, %s53_s6, [#allocation9]  }
  0x2b   :  { %625 = dma.done.wait [#allocation3], 32  }
  0x2c   :  { %626 = vsyncadd [#allocation3], 4294967264 }
  0x2d   :  { %627 = dma.done.wait [#allocation6], 64  }
  0x2e   :  { %628 = vsyncadd [#allocation6], 4294967232 }
  0x2f   :  { %629 = dma.done.wait [#allocation9], 64  }
  0x30   :  { %630 = vsyncadd [#allocation9], 4294967232  ;;  %v637_v0 = vmov 1   ;;  %v638_v1 = vmov 0   ;;  %v70_v2 = vld [vmem:[#allocation2] sm:$0x3]  ;;  %v80_v13 = vlaneseq }
  0x31   :  { %487 = vset.pattern.permute.xlu1 %v637_v0  ;;  %486 = vset.pattern.permute.xlu0 %v638_v1  ;;  %v71_v3 = vld [vmem:[#allocation5] sm:$0x3]  ;;  %v639_v4 = vmov 2   ;;  %v640_v5 = vmov 3   ;;  %v641_v6 = vmov 4   ;;  %v642_v7 = vmov 5  }
  0x32   :  { %124 = vperm.xlu1 %487, %v70_v2   ;;  %75 = vperm.xlu0 %486, %v70_v2   ;;  %v643_v8 = vmov 6   ;;  %v72_v9 = vld [vmem:[#allocation7] sm:$0x3]  ;;  %v644_v10 = vmov 7   ;;  %v645_v11 = vmov 269488144  }
  0x33   :  { %v78_v12 = vunpack.c.l.s4 %v645_v11  ;;  %v81_v17 = vshrl.u32 %v80_v13, 7  ;;  %v693_v25 = vld [vmem:[#allocation8] sm:$0xf]  ;;  %v700_v28 = vld [vmem:[%s744_s3] sm:$0xf]  ;;  %s646_s3 = smov [#allocation10]  }
  0x34   :  { %s461_s11 = sshll.u32 %s646_s3, 4  ;;  %s462_s11 = int_to_ptr.vmem [resolvable:$true] %s461_s11 }
  0x35   :  { %v79_v16 = vunpack.c.0.s8 %v78_v12  ;;  %s605_s12 = scalar_lea.vmem %s462_s11, 64  ;;  %p610_p7 = scmp.lt.s32.totalorder %s462_s11, %s462_s11 }
  0x36   :  { %136 = vperm.xlu1 %487, %v71_v3   ;;  %88 = vperm.xlu0 %486, %v71_v3   ;;  %p606_p6 = scmp.ne.s32.totalorder %s462_s11, %s605_s12  ;;  %p611_p8 = scmp.lt.s32.totalorder %s605_s12, %s605_s12 }
  0x37   :  { %v689_v20 = vsub.s32 %v79_v16, %v81_v17 }
  0x38   :  { %p612_p9 = por %p611_p8, %p610_p7 }
  0x3a   :  { %489 = vset.pattern.permute.xlu1 %v639_v4  ;;  %488 = vset.pattern.permute.xlu0 %v639_v4  ;;  %p613_p10 = pnand %p612_p9, %p606_p6 }
  0x3b   :  { %183 = vperm.xlu1 %489, %v71_v3   ;;  %171 = vperm.xlu0 %488, %v70_v2  }
  0x3f   :  { %490 = vset.pattern.permute.xlu1 %v640_v5  ;;  %491 = vset.pattern.permute.xlu0 %v640_v5 }
  0x40   :  { %218 = vperm.xlu1 %490, %v70_v2   ;;  %230 = vperm.xlu0 %491, %v71_v3  }
  0x44   :  { %492 = vset.pattern.permute.xlu1 %v641_v6  ;;  %493 = vset.pattern.permute.xlu0 %v642_v7 }
  0x45   :  { %265 = vperm.xlu1 %492, %v70_v2   ;;  %312 = vperm.xlu0 %493, %v70_v2  }
  0x49   :  { %277 = vperm.xlu1 %492, %v71_v3   ;;  %496 = vset.pattern.permute.xlu0 %v643_v8 }
  0x4a   :  { %371 = vperm.xlu0 %496, %v71_v3  }
  0x4d   :  { %494 = vset.pattern.permute.xlu1 %v642_v7 }
  0x4e   :  { %324 = vperm.xlu1 %494, %v71_v3   ;;  %498 = vset.pattern.permute.xlu0 %v638_v1 }
  0x4f   :  { %111 = vperm.xlu0 %498, %v72_v9  }
  0x52   :  { %495 = vset.pattern.permute.xlu1 %v643_v8 }
  0x53   :  { %359 = vperm.xlu1 %495, %v70_v2   ;;  %501 = vset.pattern.permute.xlu0 %v640_v5 }
  0x54   :  { %252 = vperm.xlu0 %501, %v72_v9  }
  0x57   :  { %497 = vset.pattern.permute.xlu1 %v644_v10 }
  0x58   :  { %406 = vperm.xlu1 %497, %v70_v2   ;;  %504 = vset.pattern.permute.xlu0 %v643_v8 }
  0x59   :  { %393 = vperm.xlu0 %504, %v72_v9  }
  0x5c   :  { %418 = vperm.xlu1 %497, %v71_v3  }
  0x5d   :  { %506 = vset.pattern.permute.xlu0 %v644_v10 }
  0x60   :  { %499 = vset.pattern.permute.xlu1 %v637_v0 }
  0x61   :  { %158 = vperm.xlu1 %499, %v72_v9  }
  0x65   :  { %500 = vset.pattern.permute.xlu1 %v639_v4 }
  0x66   :  { %205 = vperm.xlu1 %500, %v72_v9  }
  0x6a   :  { %502 = vset.pattern.permute.xlu1 %v641_v6 }
  0x6b   :  { %299 = vperm.xlu1 %502, %v72_v9  }
  0x6f   :  { %503 = vset.pattern.permute.xlu1 %v642_v7 }
  0x70   :  { %346 = vperm.xlu1 %503, %v72_v9  }
  0x74   :  { %505 = vset.pattern.permute.xlu1 %v644_v10 }
  0x75   :  { %440 = vperm.xlu1 %505, %v72_v9  }
  0xad   :  { %v125_v14 = vpop.permute.xlu1 %124  ;;  %v76_v15 = vpop.permute.xlu0 %75 }
  0xae   :  { %v83_v24 = vrot.slane %v76_v15, %v689_v20  ;;  %v132_v27 = vrot.slane %v125_v14, %v689_v20 }
  0xb0   :  { %v85_v34 = vsub.f32 %v700_v28, %v83_v24  ;;  %v134_v38 = vsub.f32 %v700_v28, %v132_v27 }
  0xb1   :  { %v137_v18 = vpop.permute.xlu1 %136  ;;  %v89_v19 = vpop.permute.xlu0 %88 }
  0xb2   :  { %v144_v23 = vrot.slane %v137_v18, %v689_v20  ;;  %v96_v26 = vrot.slane %v89_v19, %v689_v20  ;;  %v99_v42 = vmul.f32 %v85_v34, %v85_v34  ;;  %v147_v47 = vmul.f32 %v134_v38, %v134_v38 }
  0xb4   :  { %v146_v31 = vsub.f32 %v693_v25, %v144_v23  ;;  %v98_v35 = vsub.f32 %v693_v25, %v96_v26 }
  0xb6   :  { %v184_v21 = vpop.permute.xlu1 %183  ;;  %v172_v22 = vpop.permute.xlu0 %171  ;;  %v148_v41 = vmul.f32 %v146_v31, %v146_v31  ;;  %v100_v43 = vmul.f32 %v98_v35, %v98_v35 }
  0xb7   :  { %v191_v29 = vrot.slane %v184_v21, %v689_v20  ;;  %v179_v30 = vrot.slane %v172_v22, %v689_v20 }
  0xb8   :  { %v149_v52 = vadd.f32 %v148_v41, %v147_v47  ;;  %v101_v53 = vadd.f32 %v100_v43, %v99_v42 }
  0xb9   :  { %v193_v39 = vsub.f32 %v693_v25, %v191_v29  ;;  %v181_v40 = vsub.f32 %v700_v28, %v179_v30 }
  0xba   :  { %vm150_vm0 = vcmp.eq.f32.partialorder %v149_v52, 0.0  ;;  %vm102_vm1 = vcmp.eq.f32.partialorder %v101_v53, 0.0 }
  0xbb   :  { %v219_v32 = vpop.permute.xlu1 %218  ;;  %v231_v33 = vpop.permute.xlu0 %230  ;;  %v195_v49 = vmul.f32 %v193_v39, %v193_v39  ;;  %v194_v50 = vmul.f32 %v181_v40, %v181_v40  ;;  %v151_v5 = vsel %vm150_vm0, 1.4210855e-14, %v149_v52  ;;  %v103_v7 = vsel %vm102_vm1, 1.4210855e-14, %v101_v53 }
  0xbc   :  { %v226_v36 = vrot.slane %v219_v32, %v689_v20  ;;  %v238_v37 = vrot.slane %v231_v33, %v689_v20  ;;  %507 = vrcp.f32 %v151_v5 }
  0xbd   :  { %v196_v60 = vadd.f32 %v195_v49, %v194_v50  ;;  %509 = vrcp.f32 %v103_v7 }
  0xbe   :  { %v228_v44 = vsub.f32 %v700_v28, %v226_v36  ;;  %v240_v45 = vsub.f32 %v693_v25, %v238_v37 }
  0xbf   :  { %vm197_vm2 = vcmp.eq.f32.partialorder %v196_v60, 0.0 }
  0xc0   :  { %v266_v46 = vpop.permute.xlu1 %265  ;;  %v313_v51 = vpop.permute.xlu0 %312  ;;  %v241_v54 = vmul.f32 %v228_v44, %v228_v44  ;;  %v242_v55 = vmul.f32 %v240_v45, %v240_v45  ;;  %v198_v11 = vsel %vm197_vm2, 1.4210855e-14, %v196_v60 }
  0xc1   :  { %v273_v48 = vrot.slane %v266_v46, %v689_v20  ;;  %v320_v57 = vrot.slane %v313_v51, %v689_v20  ;;  %511 = vrcp.f32 %v198_v11 }
  0xc2   :  { %v243_v62 = vadd.f32 %v242_v55, %v241_v54 }
  0xc3   :  { %v275_v58 = vsub.f32 %v700_v28, %v273_v48  ;;  %v322_v63 = vsub.f32 %v700_v28, %v320_v57 }
  0xc4   :  { %v278_v56 = vpop.permute.xlu1 %277  ;;  %vm244_vm3 = vcmp.eq.f32.partialorder %v243_v62, 0.0 }
  0xc5   :  { %v285_v59 = vrot.slane %v278_v56, %v689_v20  ;;  %v372_v0 = vpop.permute.xlu0 %371  ;;  %v288_v1 = vmul.f32 %v275_v58, %v275_v58  ;;  %v335_v9 = vmul.f32 %v322_v63, %v322_v63  ;;  %v245_v15 = vsel %vm244_vm3, 1.4210855e-14, %v243_v62 }
  0xc6   :  { %v379_v4 = vrot.slane %v372_v0, %v689_v20  ;;  %513 = vrcp.f32 %v245_v15 }
  0xc7   :  { %v287_v61 = vsub.f32 %v693_v25, %v285_v59 }
  0xc8   :  { %v381_v12 = vsub.f32 %v693_v25, %v379_v4 }
  0xc9   :  { %v289_v2 = vmul.f32 %v287_v61, %v287_v61  ;;  %v325_v3 = vpop.permute.xlu1 %324  ;;  %v508_v33 = vpop.eup %507 }
  0xca   :  { %v332_v6 = vrot.slane %v325_v3, %v689_v20  ;;  %v383_v19 = vmul.f32 %v381_v12, %v381_v12  ;;  %v510_v35 = vpop.eup %509  ;;  %v153_v41 = vmul.f32 %v508_v33, %v151_v5  ;;  %v112_v57 = vpop.permute.xlu0 %111 }
  0xcb   :  { %v290_v8 = vadd.f32 %v289_v2, %v288_v1  ;;  %v105_v39 = vmul.f32 %v510_v35, %v103_v7  ;;  %v119_v1 = vrot.slane %v112_v57, %v689_v20 }
  0xcc   :  { %v334_v10 = vsub.f32 %v693_v25, %v332_v6  ;;  %v154_v48 = vsub.f32 2.0, %v153_v41 }
  0xcd   :  { %vm291_vm4 = vcmp.eq.f32.partialorder %v290_v8, 0.0 }
  0xce   :  { %v336_v13 = vmul.f32 %v334_v10, %v334_v10  ;;  %v360_v14 = vpop.permute.xlu1 %359  ;;  %v292_v18 = vsel %vm291_vm4, 1.4210855e-14, %v290_v8  ;;  %v512_v38 = vpop.eup %511  ;;  %v155_v54 = vmul.f32 %v508_v33, %v154_v48 }
  0xcf   :  { %v367_v16 = vrot.slane %v360_v14, %v689_v20  ;;  %515 = vrcp.f32 %v292_v18  ;;  %v200_v43 = vmul.f32 %v512_v38, %v198_v11  ;;  %v253_v12 = vpop.permute.xlu0 %252 }
  0xd0   :  { %v337_v17 = vadd.f32 %v336_v13, %v335_v9 }
  0xd1   :  { %v369_v21 = vsub.f32 %v700_v28, %v367_v16  ;;  %v201_v50 = vsub.f32 2.0, %v200_v43 }
  0xd2   :  { %vm338_vm5 = vcmp.eq.f32.partialorder %v337_v17, 0.0 }
  0xd3   :  { %v339_v22 = vsel %vm338_vm5, 1.4210855e-14, %v337_v17  ;;  %v382_v23 = vmul.f32 %v369_v21, %v369_v21  ;;  %v407_v24 = vpop.permute.xlu1 %406  ;;  %v514_v42 = vpop.eup %513  ;;  %v202_v58 = vmul.f32 %v512_v38, %v201_v50  ;;  %v260_v17 = vrot.slane %v253_v12, %v689_v20 }
  0xd4   :  { %v414_v26 = vrot.slane %v407_v24, %v689_v20  ;;  %517 = vrcp.f32 %v339_v22  ;;  %v247_v47 = vmul.f32 %v514_v42, %v245_v15 }
  0xd5   :  { %v384_v27 = vadd.f32 %v383_v19, %v382_v23 }
  0xd6   :  { %v416_v31 = vsub.f32 %v700_v28, %v414_v26  ;;  %v106_v28 = vsub.f32 2.0, %v105_v39  ;;  %v248_v53 = vsub.f32 2.0, %v247_v47 }
  0xd7   :  { %vm385_vm6 = vcmp.eq.f32.partialorder %v384_v27, 0.0  ;;  %v419_v29 = vpop.permute.xlu1 %418 }
  0xd8   :  { %v386_v30 = vsel %vm385_vm6, 1.4210855e-14, %v384_v27  ;;  %v426_v32 = vrot.slane %v419_v29, %v689_v20  ;;  %v429_v36 = vmul.f32 %v416_v31, %v416_v31  ;;  %v107_v52 = vmul.f32 %v510_v35, %v106_v28 }
  0xd9   :  { %519 = vrcp.f32 %v386_v30  ;;  %v249_v61 = vmul.f32 %v514_v42, %v248_v53 }
  0xda   :  { %v428_v34 = vsub.f32 %v693_v25, %v426_v32  ;;  %v156_v62 = vadd.f32 %v155_v54, %v107_v52  ;;  %v121_v11 = vmul.f32 %v119_v1, %v107_v52 }
  0xdb   :  { %v262_v29 = vmul.f32 %v260_v17, %v249_v61 }
  0xdc   :  { %v430_v37 = vmul.f32 %v428_v34, %v428_v34  ;;  %v516_v44 = vpop.eup %515  ;;  %v159_v46 = vpop.permute.xlu1 %158  ;;  %v203_v2 = vadd.f32 %v202_v58, %v156_v62 }
  0xdd   :  { %v294_v25 = vmul.f32 %v516_v44, %v292_v18  ;;  %v166_v63 = vrot.slane %v159_v46, %v689_v20  ;;  %v394_v34 = vpop.permute.xlu0 %393 }
  0xde   :  { %v431_v40 = vadd.f32 %v430_v37, %v429_v36  ;;  %v250_v8 = vadd.f32 %v249_v61, %v203_v2  ;;  %v401_v38 = vrot.slane %v394_v34, %v689_v20 }
  0xdf   :  { %v295_v59 = vsub.f32 2.0, %v294_v25  ;;  %v168_v7 = vmul.f32 %v166_v63, %v155_v54 }
  0xe0   :  { %vm432_vm7 = vcmp.eq.f32.partialorder %v431_v40, 0.0 }
  0xe1   :  { %v433_v45 = vsel %vm432_vm7, 1.4210855e-14, %v431_v40  ;;  %v518_v49 = vpop.eup %517  ;;  %v206_v56 = vpop.permute.xlu1 %205  ;;  %v296_v4 = vmul.f32 %v516_v44, %v295_v59  ;;  %v169_v18 = vadd.f32 %v168_v7, %v121_v11 }
  0xe2   :  { %521 = vrcp.f32 %v433_v45  ;;  %v341_v55 = vmul.f32 %v518_v49, %v339_v22  ;;  %v213_v3 = vrot.slane %v206_v56, %v689_v20 }
  0xe3   :  { %v297_v14 = vadd.f32 %v296_v4, %v250_v8 }
  0xe4   :  { %v342_v0 = vsub.f32 2.0, %v341_v55  ;;  %v215_v13 = vmul.f32 %v213_v3, %v202_v58 }
  0xe6   :  { %v520_v51 = vpop.eup %519  ;;  %v300_v6 = vpop.permute.xlu1 %299  ;;  %v343_v9 = vmul.f32 %v518_v49, %v342_v0  ;;  %v216_v23 = vadd.f32 %v215_v13, %v169_v18 }
  0xe7   :  { %v388_v60 = vmul.f32 %v520_v51, %v386_v30  ;;  %v307_v24 = vrot.slane %v300_v6, %v689_v20 }
  0xe8   :  { %v344_v19 = vadd.f32 %v343_v9, %v297_v14  ;;  %v263_v32 = vadd.f32 %v262_v29, %v216_v23 }
  0xe9   :  { %v389_v5 = vsub.f32 2.0, %v388_v60  ;;  %v309_v33 = vmul.f32 %v307_v24, %v296_v4 }
  0xeb   :  { %v390_v15 = vmul.f32 %v520_v51, %v389_v5  ;;  %v347_v22 = vpop.permute.xlu1 %346  ;;  %v310_v37 = vadd.f32 %v309_v33, %v263_v32 }
  0xec   :  { %v354_v30 = vrot.slane %v347_v22, %v689_v20 }
  0xed   :  { %v391_v26 = vadd.f32 %v390_v15, %v344_v19  ;;  %v403_v41 = vmul.f32 %v401_v38, %v390_v15 }
  0xee   :  { %v356_v36 = vmul.f32 %v354_v30, %v343_v9 }
  0xef   :  { %v522_v10 = vpop.eup %521 }
  0xf0   :  { %v435_v16 = vmul.f32 %v522_v10, %v433_v45  ;;  %v441_v35 = vpop.permute.xlu1 %440  ;;  %v357_v40 = vadd.f32 %v356_v36, %v310_v37 }
  0xf1   :  { %v448_v39 = vrot.slane %v441_v35, %v689_v20 }
  0xf2   :  { %v436_v21 = vsub.f32 2.0, %v435_v16  ;;  %v404_v43 = vadd.f32 %v403_v41, %v357_v40 }
  0xf4   :  { %v437_v27 = vmul.f32 %v522_v10, %v436_v21 }
  0xf6   :  { %v438_v31 = vadd.f32 %v437_v27, %v391_v26  ;;  %v450_v42 = vmul.f32 %v448_v39, %v437_v27 }
  0xf8   :  { %523 = vrcp.f32 %v438_v31  ;;  %v451_v44 = vadd.f32 %v450_v42, %v404_v43 }
 0x105   :  { %v524_v45 = vpop.eup %523 }
 0x106   :  { %v453_v46 = vmul.f32 %v524_v45, %v451_v44 }
 0x108   :  { %454 = vst [vmem:[#allocation10] sm:$0xf] %v453_v46 }
 0x109   :  { %616 = shalt.err (!%p613_p10)
}
 0x10a   :  { %464 = dma.vmem_to_hbm [thread:$0]  %s462_s11, 64, %s746_s5, [#allocation4]  }
 0x10b   :  { %631 = dma.done.wait [#allocation4], 64  }
 0x10c   :  { %632 = vsyncadd [#allocation4], 4294967232 }
 0x10d   :  { %468 = vsyncpa [#allocation3], 1 }
 0x10e   :  { %469 = vsyncpa [#allocation6], 1 }
 0x10f   :  { %470 = vsyncpa [#allocation9], 1 }
 0x110   :  { %471 = vsyncpa [#allocation4], 1 }

</bundles_post_ra>
